<compile_context>
chip_gen: v7x
topology: tpu7x:2x2x1
jax: 0.10.0
libtpu: 0.0.40
codegen_flags: <defaults>
</compile_context>

<pallas_src>
import functools

import jax
import jax.numpy as jnp
from jax.experimental import pallas as pl
from jax.experimental.pallas import tpu as pltpu


_OUT_SUB, _OUT_LANE = 8, 128   # one lane-dense (8,128) output block per tile


def _contrastive_kernel(x0_ref, x1_ref, y_ref, out_ref, *, margin, true_rows,
                        block_rows):
    # x0_ref, x1_ref: (TB, D) VMEM tiles; y_ref: (TB, 1); out_ref: (8, 128).
    i = pl.program_id(0)

    x0 = x0_ref[...].astype(jnp.float32)
    x1 = x1_ref[...].astype(jnp.float32)
    y = y_ref[...].astype(jnp.float32)                        # (TB, 1)

    diff = x0 - x1                                            # (TB, D)  VPU
    dist_sq = jnp.sum(diff * diff, axis=1, keepdims=True)     # (TB, 1)  XLU
    dist = jnp.sqrt(dist_sq)                                  # (TB, 1)  EUP
    mdist = jnp.maximum(margin - dist, 0.0)                   # clamp(m - d, 0)
    loss = y * dist_sq + (1.0 - y) * (mdist * mdist)          # (TB, 1)

    # Mask rows past the true batch (partial trailing block reads stale VMEM).
    # jnp.where is a select, so NaN/Inf from garbage rows cannot leak.
    row = i * block_rows + jax.lax.broadcasted_iota(jnp.int32, loss.shape, 0)
    masked = jnp.where(row < true_rows, loss, 0.0)

    # Per-tile partial sum, broadcast into a lane-dense (8,128) block so the
    # writeback is a plain unmasked store (no vst.msk / strided (TB,1) DMA).
    partial = jnp.sum(masked, axis=0, keepdims=True)          # (1, 1)
    out_ref[...] = jnp.broadcast_to(partial, (_OUT_SUB, _OUT_LANE))


def _sublane_multiple(itemsize):
    # 8 for f32, 16 for bf16/f16, 32 for int8/fp8 — matches packed tiles.
    return 8 * max(1, 4 // int(itemsize))


def _per_row_vmem_bytes(feat, it0, it1):
    """Estimated steady-state VMEM bytes per batch row."""
    inputs = feat * 2 * (it0 + it1)    # 2 pipeline buffers per input, native dtype
    temps = feat * 3 * 4               # ~3 full-tile f32 intermediates (casts/diff/diff^2)
    rowvecs = 3072                     # lane-padded (TB,1) f32 vectors + y buffers
    return inputs + temps + rowvecs


def _pick_block_rows(batch, feat, it0, it1, vmem_budget_bytes=40 << 20):
    """Largest dtype-aligned row tile fitting the VMEM budget, >= 2 tiles."""
    mult = max(_sublane_multiple(it0), _sublane_multiple(it1))
    per_row = _per_row_vmem_bytes(feat, it0, it1)
    tb = (vmem_budget_bytes // per_row) // mult * mult
    tb = max(mult, tb)
    # Keep >= 2 roughly balanced tiles so the "parallel" grid axis feeds both
    # v7x TensorCores (a single jumbo tile would idle one TC).
    half = ((batch + 1) // 2 + mult - 1) // mult * mult
    tb = min(tb, half)
    if tb >= batch:
        return batch                    # full-extent block: always layout-legal
    return tb


def contrastive_loss(x0, x1, y, margin=1.0, block_rows=None):
    """Pallas implementation of ContrastiveLoss.forward.

    x0, x1: (B, D) float arrays (any float dtype; kept native in HBM).
    y: (B,) labels. Returns a scalar f32 loss.
    """
    B, D = x0.shape
    it0 = jnp.dtype(x0.dtype).itemsize
    it1 = jnp.dtype(x1.dtype).itemsize
    if block_rows is None:
        block_rows = _pick_block_rows(B, D, it0, it1)
    tb = int(block_rows)
    num_tiles = int(pl.cdiv(B, tb))

    y2d = y.reshape(B, 1)  # last dim == full extent -> legal sub-128 block

    kernel = functools.partial(_contrastive_kernel, margin=float(margin),
                               true_rows=B, block_rows=tb)

    # Explicit scoped-VMEM limit: sized for the actual tile budget + headroom
    # (defaults are 16 MiB on v5e / 32 MiB on v6e-v7x; physical >= 64 MiB/TC).
    est_vmem = tb * _per_row_vmem_bytes(D, it0, it1) + (1 << 20)
    vmem_limit = int(min(48 << 20, max(32 << 20, est_vmem + (8 << 20))))

    bytes_accessed = (B * D * (it0 + it1)
                      + B * jnp.dtype(y2d.dtype).itemsize
                      + num_tiles * _OUT_SUB * _OUT_LANE * 4)

    per_tile = pl.pallas_call(
        kernel,
        out_shape=jax.ShapeDtypeStruct((num_tiles * _OUT_SUB, _OUT_LANE),
                                       jnp.float32),
        grid=(num_tiles,),
        in_specs=[
            pl.BlockSpec((tb, D), lambda i: (i, 0)),
            pl.BlockSpec((tb, D), lambda i: (i, 0)),
            pl.BlockSpec((tb, 1), lambda i: (i, 0)),
        ],
        out_specs=pl.BlockSpec((_OUT_SUB, _OUT_LANE), lambda i: (i, 0)),
        compiler_params=pltpu.CompilerParams(
            dimension_semantics=("parallel",),
            vmem_limit_bytes=vmem_limit),
        cost_estimate=pl.CostEstimate(
            flops=3 * B * D + 8 * B,
            transcendentals=B,
            bytes_accessed=int(bytes_accessed)),
    )(x0, x1, y2d)

    # Tiny epilogue: one partial per tile (element [i*8, 0] of each block).
    partials = per_tile.reshape(num_tiles, _OUT_SUB * _OUT_LANE)[:, 0]
    return jnp.sum(partials) / 2.0 / B


def _reference(x0, x1, y, margin=1.0):
    diff = x0 - x1
    dist_sq = jnp.sum(diff * diff, axis=1)
    dist = jnp.sqrt(dist_sq)
    mdist = jnp.maximum(margin - dist, 0.0)
    loss = y * dist_sq + (1.0 - y) * mdist * mdist
    return jnp.sum(loss) / 2.0 / x0.shape[0]


if __name__ == "__main__":
    key = jax.random.PRNGKey(0)
    k0, k1, ky = jax.random.split(key, 3)

    # 1) Small f32 example: batch=16, hidden=128 (auto tile -> 2 balanced tiles).
    B, D = 16, 128
    x0 = jax.random.normal(k0, (B, D), dtype=jnp.float32)
    x1 = jax.random.normal(k1, (B, D), dtype=jnp.float32)
    y = jax.random.bernoulli(ky, 0.5, (B,)).astype(jnp.float32)
    loss = contrastive_loss(x0, x1, y, margin=1.0)
    jax.block_until_ready(loss)
    ref = _reference(x0, x1, y, margin=1.0)
    assert jnp.allclose(loss, ref, rtol=1e-5, atol=1e-6), (loss, ref)

    # 2) Ragged batch + native bf16 + explicit tile: exercises the partial
    #    trailing block, in-kernel masking, and the no-upcast streaming path.
    B2 = 13
    x0b = jax.random.normal(k0, (B2, D), dtype=jnp.bfloat16)
    x1b = jax.random.normal(k1, (B2, D), dtype=jnp.bfloat16)
    yb = jax.random.bernoulli(ky, 0.5, (B2,)).astype(jnp.float32)
    loss2 = contrastive_loss(x0b, x1b, yb, margin=1.0, block_rows=8)
    jax.block_until_ready(loss2)
    ref2 = _reference(x0b.astype(jnp.float32), x1b.astype(jnp.float32), yb, 1.0)
    assert jnp.allclose(loss2, ref2, rtol=1e-3, atol=1e-4), (loss2, ref2)

    # 3) bf16 with auto tile picking: multiple-of-16 TB, 2 tiles, masked tail.
    B3, D3 = 48, 256
    x0c = jax.random.normal(k0, (B3, D3), dtype=jnp.bfloat16)
    x1c = jax.random.normal(k1, (B3, D3), dtype=jnp.bfloat16)
    yc = jax.random.bernoulli(ky, 0.5, (B3,)).astype(jnp.float32)
    loss3 = contrastive_loss(x0c, x1c, yc, margin=1.0)
    jax.block_until_ready(loss3)
    ref3 = _reference(x0c.astype(jnp.float32), x1c.astype(jnp.float32), yc, 1.0)
    assert jnp.allclose(loss3, ref3, rtol=1e-3, atol=1e-4), (loss3, ref3)

    print("KERNEL_OK")
</pallas_src>

<mosaic_0001>
module attributes {stable_mosaic.version = 11 : i64} {
  func.func @_contrastive_kernel(%arg0: i32, %arg1: memref<8x128xf32, #tpu.memory_space<vmem>>, %arg2: memref<8x128xf32, #tpu.memory_space<vmem>>, %arg3: memref<8x1xf32, #tpu.memory_space<vmem>>, %arg4: memref<8x128xf32, #tpu.memory_space<vmem>>) attributes {dimension_semantics = [#tpu.dimension_semantics<parallel>], iteration_bounds = array<i64: 2>, scalar_prefetch = 0 : i64, scratch_operands = 0 : i64, tpu.core_type = #tpu.core_type<tc>, window_params = [{transform_indices = @transform_0, window_bounds = array<i64: 8, 128>}, {transform_indices = @transform_1, window_bounds = array<i64: 8, 128>}, {transform_indices = @transform_2, window_bounds = array<i64: 8, 1>}, {transform_indices = @transform_3, window_bounds = array<i64: 8, 128>}]} {
    %c0 = arith.constant 0 : index
    %c0_0 = arith.constant 0 : index
    %0 = vector.load %arg1[%c0, %c0_0] : memref<8x128xf32, #tpu.memory_space<vmem>>, vector<8x128xf32>
    %c0_1 = arith.constant 0 : index
    %c0_2 = arith.constant 0 : index
    %1 = vector.load %arg2[%c0_1, %c0_2] : memref<8x128xf32, #tpu.memory_space<vmem>>, vector<8x128xf32>
    %c0_3 = arith.constant 0 : index
    %c0_4 = arith.constant 0 : index
    %2 = vector.load %arg3[%c0_3, %c0_4] : memref<8x1xf32, #tpu.memory_space<vmem>>, vector<8x1xf32>
    %3 = arith.subf %0, %1 : vector<8x128xf32>
    %4 = arith.mulf %3, %3 : vector<8x128xf32>
    %cst = arith.constant dense<0.000000e+00> : vector<8xf32>
    %5 = vector.multi_reduction <add>, %4, %cst [1] : vector<8x128xf32> to vector<8xf32>
    %6 = vector.shape_cast %5 : vector<8xf32> to vector<8x1xf32>
    %7 = math.sqrt %6 : vector<8x1xf32>
    %cst_5 = arith.constant 1.000000e+00 : f32
    %8 = vector.broadcast %cst_5 : f32 to vector<8x1xf32>
    %9 = arith.subf %8, %7 : vector<8x1xf32>
    %cst_6 = arith.constant 0.000000e+00 : f32
    %10 = vector.broadcast %cst_6 : f32 to vector<8x1xf32>
    %11 = arith.maximumf %9, %10 : vector<8x1xf32>
    %12 = arith.mulf %2, %6 : vector<8x1xf32>
    %cst_7 = arith.constant 1.000000e+00 : f32
    %13 = vector.broadcast %cst_7 : f32 to vector<8x1xf32>
    %14 = arith.subf %13, %2 : vector<8x1xf32>
    %15 = arith.mulf %11, %11 : vector<8x1xf32>
    %16 = arith.mulf %14, %15 : vector<8x1xf32>
    %17 = arith.addf %12, %16 : vector<8x1xf32>
    %c8_i32 = arith.constant 8 : i32
    %18 = arith.muli %arg0, %c8_i32 : i32
    %19 = tpu.iota {dimensions = array<i32: 0>} : vector<8x1xi32>
    %20 = vector.broadcast %18 : i32 to vector<8x1xi32>
    %21 = arith.addi %20, %19 : vector<8x1xi32>
    %c16_i32 = arith.constant 16 : i32
    %22 = vector.broadcast %c16_i32 : i32 to vector<8x1xi32>
    %23 = arith.cmpi slt, %21, %22 : vector<8x1xi32>
    %cst_8 = arith.constant 0.000000e+00 : f32
    %24 = vector.broadcast %cst_8 : f32 to vector<8x1xf32>
    %25 = arith.select %23, %17, %24 : vector<8x1xi1>, vector<8x1xf32>
    %cst_9 = arith.constant dense<0.000000e+00> : vector<1xf32>
    %26 = vector.multi_reduction <add>, %25, %cst_9 [0] : vector<8x1xf32> to vector<1xf32>
    %27 = vector.shape_cast %26 : vector<1xf32> to vector<1x1xf32>
    %28 = vector.shape_cast %27 : vector<1x1xf32> to vector<1x1xf32>
    %29 = vector.broadcast %28 : vector<1x1xf32> to vector<8x128xf32>
    %c0_10 = arith.constant 0 : index
    %c0_11 = arith.constant 0 : index
    %30 = vector.load %arg4[%c0_10, %c0_11] : memref<8x128xf32, #tpu.memory_space<vmem>>, vector<8x128xf32>
    tpu.vector_store %arg4[%c0_10, %c0_11], %29 {strides = array<i32>} : memref<8x128xf32, #tpu.memory_space<vmem>>, vector<8x128xf32>,
    return
  }
  func.func @transform_0(%arg0: i32) -> (i32, i32) {
    %c0_i32 = arith.constant 0 : i32
    %c0_i32_0 = arith.constant 0 : i32
    return %arg0, %c0_i32 : i32, i32
  }
  func.func @transform_1(%arg0: i32) -> (i32, i32) {
    %c0_i32 = arith.constant 0 : i32
    %c0_i32_0 = arith.constant 0 : i32
    return %arg0, %c0_i32 : i32, i32
  }
  func.func @transform_2(%arg0: i32) -> (i32, i32) {
    %c0_i32 = arith.constant 0 : i32
    %c0_i32_0 = arith.constant 0 : i32
    return %arg0, %c0_i32 : i32, i32
  }
  func.func @transform_3(%arg0: i32) -> (i32, i32) {
    %c0_i32 = arith.constant 0 : i32
    %c0_i32_0 = arith.constant 0 : i32
    return %arg0, %c0_i32 : i32, i32
  }
}

</mosaic_0001>

<bundles_post_ra>
// kernel: tpu_custom_call.1
= control target key start
LH: loop header
LB: loop body
LE: loop exit
PB: predicated region body
PF: predicated region fallthrough
CT: control target
= control target key end

     0   :  { %8 = vsyncpa [#allocation3], 0  ;;  %s730_s0 = inlined_call_operand.vmem [shape: f32[16,128], index: 0, kind: input, shape index: {}]   ;;  %s731_s1 = inlined_call_operand.hbm [shape: f32[16,128], index: 1, kind: input, shape index: {}]   ;;  %s732_s2 = inlined_call_operand.vmem [shape: f32[16,1], index: 2, kind: input, shape index: {}]   ;;  %s733_s3 = inlined_call_operand.hbm [shape: f32[16,128], index: 3, kind: output, shape index: {}]  }
   0x1   :  { %10 = vsyncpa [#allocation3 + $0x1], 0 }
   0x2   :  { %11 = vsyncpa [#allocation4], 0 }
   0x3   :  { %13 = vsyncpa [#allocation4 + $0x1], 0  ;;  %s556_s12 = smov 0   ;;  %s558_s13 = smov 0  }
   0x4   :  { %s560_s14 = smov 0   ;;  %s562_s15 = smov 0  }
   0x5 LB: > { %s577_s16 = sadd.s32 4294967295, %s531_s15   ;;  %s370_s17 = sadd.s32 4294967294, %s531_s15   ;;  %s531_s15 = sphi %s562_s15, %s748_s15   ;;  %s527_s14 = sphi %s560_s14, %s747_s14   ;;  %s523_s13 = sphi %s558_s13, %s746_s13   ;;  %s519_s12 = sphi %s556_s12, %s745_s12  }
   0x6   : > { %s581_s18 = sadd.s32 1, %s531_s15   ;;  %s52_s19 = sadd.s32 1, %s527_s14 }
   0x7   : > { %s49_s20 = ssub.s32 %s531_s15, %s581_s18  ;;  %p59_p0 = scmp.ne.s32.totalorder %s527_s14, %s523_s13 }
   0x8   : > { %p50_p1 = scmp.eq.s32.totalorder %s49_s20, 0  ;;  %p60_p2 = scmp.eq.s32.totalorder %s531_s15, 0 }
   0x9   : > { %p65_p3 = scmp.ne.s32.totalorder %s523_s13, %s519_s12  ;;  %p66_p4 = scmp.eq.s32.totalorder %s577_s16, 0 }
   0xa   : > { %s593_s21 = scalar_select %p50_p1, %s527_s14, %s52_s19  }
   0xb   : > { %p595_p5 = por %p60_p2, %p59_p0  ;;  %p599_p6 = por %p66_p4, %p65_p3 }
   0xc   : > { %p115_p7 = scmp.eq.s32.totalorder %s577_s16, 1  ;;  %p121_p8 = scmp.eq.s32.totalorder %s370_s17, 1 }
   0xd   : > { %p397_p10 = scmp.lt.s32.totalorder %s531_s15, 2  ;;  %s148_s26 = sand.u32 1, %s527_s14  }
   0xe   : > { %p606_p11 = por %p115_p7, %p59_p0  ;;  %p610_p12 = por %p121_p8, %p65_p3 }
   0xf   : > { %s374_s27 = sshll.u32 %s531_s15, 7  ;;  %s373_s28 = sshll.u32 %s148_s26, 3 }
  0x10   : > { %s737_s24 = scalar_select %p606_p11, 1, 0 }
  0x11   : > { %s738_s25 = scalar_select %p610_p12, 1, 0 }
  0x12   : > { %s619_s4 = scalar_lea.hbm %s731_s1, %s374_s27  ;;  %s152_s5 = scalar_lea.vmem [#allocation2], %s373_s28 }
  0x13   : > { %s159_s6 = sshll.u32 %s152_s5, 4  ;;  %p623_p13 = pnand %p397_p10, %p595_p5  ;;  %s627_s6 = int_to_ptr.vmem [resolvable:$true] %s159_s6 }
  0x14   : > { %s149_s8 = scalar_lea.sflag [#allocation3], %s148_s26  ;;  %s435_s9 = scalar_lea.hbm %s619_s4, 128 }
  0x15   : > { %p436_p2 = scmp.ne.s32.totalorder %s619_s4, %s435_s9  ;;  %p437_p3 = pneg %p623_p13 }
  0x16   : > { %s440_s17 = scalar_lea.hbm %s731_s1, 256  ;;  %p441_p5 = scmp.lt.u32.totalorder %s619_s4, %s731_s1 }
  0x17   : > { %p438_p4 = pnand %p437_p3, %p436_p2  ;;  %p442_p8 = scmp.lt.u32.totalorder %s440_s17, %s435_s9 }
  0x18   : > { %p444_p9 = scmp.lt.u32.totalorder %s435_s9, %s619_s4 }
  0x19   : > { %p439_p7 = pneg %p438_p4  ;;  %p443_p10 = por %p442_p8, %p441_p5 }
  0x1b   : > { %p445_p0 = por %p444_p9, %p443_p10 }
  0x1d   : > { %p446_p1 = pnand %p445_p0, %p439_p7 }
  0x1f   : > { %449 = shalt.err (!%p446_p1)
}
  0x20   : > { %s450_s22 = scalar_lea.vmem %s627_s6, 128  ;;  %s533_s26 = smov [#allocation2]  }
  0x21   : > { %p451_p2 = scmp.ne.s32.totalorder %s627_s6, %s450_s22  ;;  %s455_s27 = sshll.u32 %s533_s26, 4  ;;  %s456_s27 = int_to_ptr.vmem [resolvable:$false] %s455_s27 }
  0x22   : > { %s457_s28 = scalar_lea.vmem %s456_s27, 256  ;;  %p458_p11 = scmp.lt.s32.totalorder %s627_s6, %s456_s27 }
  0x23   : > { %p453_p4 = pnand %p451_p2, %p437_p3  ;;  %p459_p5 = scmp.lt.s32.totalorder %s457_s28, %s450_s22 }
  0x25   : > { %p454_p12 = pneg %p453_p4  ;;  %p460_p8 = por %p459_p5, %p458_p11 }
  0x27   : > { %p461_p9 = pnand %p460_p8, %p454_p12 }
  0x29   : > { %464 = shalt.err (!%p461_p9)
}
  0x2a   : > { %392 = dma.hbm_to_vmem [thread:$0]  (!%p623_p13), %s619_s4, 128, %s627_s6, %s149_s8  }
  0x2b   : > { %p740_p0 = scmp.lt.s32.totalorder %s531_s15, 3  ;;  %p741_p1 = scmp.ge.s32.totalorder %s531_s15, 1 }
  0x2d   : > { %p172_p3 = pnand %p741_p1, %p740_p0 }
  0x2e   : > { %s661_s29 = sand.u32 (!%p172_p3), 1, %s523_s13  }
  0x2f   : > { %175 = sbr.rel (%p172_p3) target bundleno = 389 (0x185), region = 32  ;;  %s376_s30 = sshll.u32 (!%p172_p3), %s661_s29, 3 }
  0x30   : > { %s178_s5 = scalar_lea.sflag (!%p172_p3), [#allocation3], %s661_s29  ;;  %s181_s7 = scalar_lea.vmem (!%p172_p3), [#allocation2], %s376_s30 }
  0x36   : > { %510 = dma.done.wait (%p599_p6), %s178_s5, 128  }
  0x37   : > { %512 = vsyncadd (%p599_p6), %s178_s5, 4294967168  ;;  %p212_p11 = scmp.lt.s32.totalorder %s577_s16, 1  ;;  %v221_v1 = vld [vmem:[%s181_s7] sm:$0xff]  ;;  %v534_v4 = vmov 0   ;;  %v242_v7 = vlaneseq  ;;  %s380_s23 = sshll.u32 %s577_s16, 3  ;;  %vm248_vm3 = vcmask 7168  }
  0x38   : > { %432 = vset.pattern.permute.xlu0 %v534_v4  ;;  %v244_v14 = vstv %s380_s23  ;;  %s211_s20 = scalar_lea.vmem [#allocation5], %s376_s30  ;;  %s382_s26 = sshll.u32 %s577_s16, 7 }
  0x39   : > { %s213_s4 = scalar_select %p212_p11, %s577_s16, 1  ;;  %v243_v12 = vshrl.u32 %v242_v7, 7 }
  0x3a   : > { %s276_s22 = sshll.u32 %s211_s20, 4  ;;  %s688_s5 = scalar_lea.hbm %s733_s3, %s382_s26  ;;  %s683_s22 = int_to_ptr.vmem [resolvable:$true] %s276_s22 }
  0x3b   : > { %s378_s6 = sshll.u32 %s213_s4, 3  ;;  %v245_v18 = vadd.s32 %v244_v14, %v243_v12  ;;  %s263_s7 = scalar_lea.sflag [#allocation4], %s661_s29 }
  0x3c   : > { %s215_s10 = scalar_lea.vmem %s730_s0, %s378_s6  ;;  %s219_s19 = scalar_lea.vmem %s732_s2, %s378_s6 }
  0x3d   : > { %v220_v0 = vld [vmem:[%s215_s10] sm:$0xff]  ;;  %vm246_vm2 = vcmp.lt.s32.totalorder %v245_v18, 16  ;;  %s465_s4 = scalar_lea.vmem %s683_s22, 128  ;;  %p742_p12 = scmp.ne.s32.totalorder %s737_s24, 0 }
  0x3e   : > { %v223_v2 = vsub.f32 %v220_v0, %v221_v1  ;;  %v222_v15 = vld [vmem:[%s219_s19] sm:$0xff]  ;;  %p466_p6 = scmp.ne.s32.totalorder %s683_s22, %s465_s4  ;;  %s535_s30 = smov [#allocation5]  }
  0x3f   : > { %v237_v16 = vsub.f32 1.0, %v222_v15  ;;  %s469_s16 = sshll.u32 %s535_s30, 4  ;;  %s470_s16 = int_to_ptr.vmem [resolvable:$false] %s469_s16 }
  0x40   : > { %v224_v3 = vmul.f32 %v223_v2, %v223_v2  ;;  %p467_p13 = pnand %p466_p6, %p742_p12  ;;  %s471_s6 = scalar_lea.vmem %s470_s16, 256 }
  0x41   : > { %p472_p10 = scmp.lt.s32.totalorder %s683_s22, %s470_s16  ;;  %p473_p2 = scmp.lt.s32.totalorder %s471_s6, %s465_s4 }
  0x42   : > { %225 = vadd.xlane.f32.xlu0 %v224_v3  ;;  %p468_p7 = pneg %p467_p13 }
  0x43   : > { %p474_p4 = por %p473_p2, %p472_p10 }
  0x45   : > { %p475_p5 = pnand %p474_p4, %p468_p7 }
  0xcf   : > { %v226_v5 = vpop.xlane.xlu0 %225 }
  0xd0   : > { %433 = vrsqrt.f32 %v226_v5  ;;  %vm229_vm0 = vcmp.eq.f32.partialorder %v226_v5, inf  ;;  %v232_v9 = vand.u32 2147483648, %v226_v5  ;;  %vm231_vm1 = vcmp.eq.f32.partialorder %v226_v5, 0.0 }
  0xd1   : > { %v236_v20 = vmul.f32 %v226_v5, %v222_v15 }
  0xda   : > { %v434_v6 = vpop.eup %433 }
  0xdb   : > { %v228_v8 = vmul.f32 %v434_v6, %v226_v5 }
  0xdd   : > { %v230_v10 = vsel %vm229_vm0, %v226_v5, %v228_v8 }
  0xde   : > { %v233_v11 = vsel %vm231_vm1, %v232_v9, %v230_v10 }
  0xdf   : > { %v234_v13 = vsub.f32 1.0, %v233_v11 }
  0xe1   : > { %v235_v17 = vmax.f32 %v234_v13, 0.0 }
  0xe3   : > { %v238_v19 = vmul.f32 %v235_v17, %v235_v17 }
  0xe5   : > { %v239_v21 = vmul.f32 %v238_v19, %v237_v16 }
  0xe7   : > { %v240_v22 = vadd.f32 %v239_v21, %v236_v20 }
  0xe9   : > { %v247_v23 = vsel %vm246_vm2, %v240_v22, 0.0 }
  0xea   : > { %v249_v24 = vsel %vm248_vm3, %v247_v23, 0.0 }
  0xeb   : > { %v250_v25 = vrot.slane %v249_v24, 4 }
  0xed   : > { %v251_v26 = vadd.f32 %v250_v25, %v249_v24 }
  0xef   : > { %v252_v27 = vrot.slane %v251_v26, 2 }
  0xf1   : > { %v253_v28 = vadd.f32 %v252_v27, %v251_v26 }
  0xf3   : > { %v254_v29 = vrot.slane %v253_v28, 1 }
  0xf5   : > { %v255_v30 = vadd.f32 %v254_v29, %v253_v28 }
  0xf7   : > { %258 = vperm.xlu0 %432, %v255_v30  }
 0x176   : > { %v259_v31 = vpop.permute.xlu0 %258 }
 0x177   : > { %261 = vst [vmem:[%s211_s20] sm:$0xff] %v259_v31 }
 0x178   : > { %478 = shalt.err (!%p475_p5)
}
 0x179   : > { %s479_s29 = scalar_lea.hbm %s688_s5, 128  ;;  %s483_s10 = scalar_lea.hbm %s733_s3, 256 }
 0x17a   : > { %p480_p8 = scmp.ne.s32.totalorder %s688_s5, %s479_s29  ;;  %p484_p1 = scmp.lt.u32.totalorder %s688_s5, %s733_s3 }
 0x17b   : > { %p485_p3 = scmp.lt.u32.totalorder %s483_s10, %s479_s29  ;;  %p487_p6 = scmp.lt.u32.totalorder %s479_s29, %s688_s5 }
 0x17c   : > { %p481_p9 = pnand %p480_p8, %p742_p12 }
 0x17d   : > { %p486_p11 = por %p485_p3, %p484_p1 }
 0x17e   : > { %p482_p0 = pneg %p481_p9 }
 0x17f   : > { %p488_p13 = por %p487_p6, %p486_p11 }
 0x181   : > { %p489_p7 = pnand %p488_p13, %p482_p0 }
 0x183   : > { %492 = shalt.err (!%p489_p7)
}
 0x184   : > { %387 = dma.vmem_to_hbm [thread:$0]  (%p742_p12), %s683_s22, 128, %s688_s5, %s263_s7  }
 0x185 PF: > { %s288_s17 = sand.u32 1, %s519_s12   ;;  %p743_p10 = scmp.ne.s32.totalorder %s738_s25, 0 }
 0x186   : > { %p744_p2 = scmp.ge.s32.totalorder %s531_s15, 2  ;;  %s289_s19 = scalar_lea.sflag [#allocation4], %s288_s17 }
 0x188   : > { %p394_p4 = pnand %p744_p2, %p743_p10 }
 0x18a   : > { %514 = dma.done.wait (!%p394_p4), %s289_s19, 128  }
 0x18b   : > { %516 = vsyncadd (!%p394_p4), %s289_s19, 4294967168  ;;  %p16_p5 = scmp.ge.s32.totalorder %s581_s18, 4   ;;  %s745_s12 = smov %s523_s13 }
 0x18c   : > { %s746_s13 = smov %s527_s14  ;;  %s747_s14 = smov %s593_s21 }
 0x18d   : > { %s748_s15 = smov %s581_s18  ;;  %18 = sbr.rel (!%p16_p5) target bundleno = 5 (0x5), region = 83 }
 0x194   :  { %294 = vsyncpa [#allocation3], 1 }
 0x195   :  { %296 = vsyncpa [#allocation3 + $0x1], 1 }
 0x196   :  { %297 = vsyncpa [#allocation4], 1 }
 0x197   :  { %299 = vsyncpa [#allocation4 + $0x1], 1 }

</bundles_post_ra>
